<compile_context>
chip_gen: v6e
topology: v6e:2x2x1
jax: 0.10.0
libtpu: 0.0.40
codegen_flags: <defaults>
</compile_context>

<pallas_src>
import collections.abc
from dataclasses import dataclass, field
from typing import Any, Callable, List, Optional, Tuple

import jax
import jax.numpy as jnp
from jax import lax
from jax.experimental import pallas as pl
from jax.experimental.pallas import tpu as pltpu


# --------------------------------------------------------------------------
# Schema machinery (JAX port of detectron2.export.flatten schemas)
# --------------------------------------------------------------------------
@dataclass
class Schema:
    @classmethod
    def flatten(cls, obj):
        raise NotImplementedError

    def __call__(self, values):
        raise NotImplementedError

    @staticmethod
    def _concat(values):
        ret = ()
        sizes = []
        for v in values:
            assert isinstance(v, tuple), "Flattened results must be a tuple"
            ret = ret + v
            sizes.append(len(v))
        return ret, sizes

    @staticmethod
    def _split(values, sizes):
        if len(sizes):
            expected_len = sum(sizes)
            assert len(values) == expected_len
        ret = []
        for k in range(len(sizes)):
            begin, end = sum(sizes[:k]), sum(sizes[: k + 1])
            ret.append(values[begin:end])
        return ret


@dataclass
class IdentitySchema(Schema):
    def __call__(self, values):
        return values[0]

    @classmethod
    def flatten(cls, obj):
        return (obj,), cls()


@dataclass
class ListSchema(Schema):
    schemas: List[Schema] = field(default_factory=list)
    sizes: List[int] = field(default_factory=list)

    def __call__(self, values):
        values = self._split(values, self.sizes)
        if len(values) != len(self.schemas):
            raise ValueError("length mismatch between values and schemas")
        values = [m(v) for m, v in zip(self.schemas, values)]
        return list(values)

    @classmethod
    def flatten(cls, obj):
        res = [flatten_to_tuple(k) for k in obj]
        values, sizes = cls._concat([k[0] for k in res])
        return values, cls([k[1] for k in res], sizes)


@dataclass
class TupleSchema(ListSchema):
    def __call__(self, values):
        return tuple(super().__call__(values))


@dataclass
class DictSchema(ListSchema):
    keys: List[str] = field(default_factory=list)

    def __call__(self, values):
        values = super().__call__(values)
        return dict(zip(self.keys, values))

    @classmethod
    def flatten(cls, obj):
        for k in obj.keys():
            if not isinstance(k, str):
                raise KeyError("Only str keys supported")
        keys = sorted(obj.keys())
        values = [obj[k] for k in keys]
        ret, schema = ListSchema.flatten(values)
        return ret, cls(schema.schemas, schema.sizes, keys)


# TODO(synk): InstancesSchema / TensorWrapSchema (detectron2 Instances, Boxes,
# ROIMasks) have no JAX analogue here; only dict/list/tuple/tensor schemas.
def flatten_to_tuple(obj):
    schemas = [
        ((str, bytes), IdentitySchema),
        (list, ListSchema),
        (tuple, TupleSchema),
        (collections.abc.Mapping, DictSchema),
    ]
    for klass, schema in schemas:
        if isinstance(obj, klass):
            F = schema
            break
    else:
        F = IdentitySchema
    return F.flatten(obj)


# --------------------------------------------------------------------------
# Pallas kernel: fused im2col 3x3 conv + bias + ReLU (3 matmuls with K = 3*C)
# --------------------------------------------------------------------------
def _conv3x3_kernel(xp_ref, w_ref, b_ref, o_ref):
    """One grid step = one (image n, row-tile hb) output tile.

    xp_ref: [Hp, Wp, C]     bf16  zero-haloed NHWC image of batch n (resident)
    w_ref:  [3, 3*C, Cout]  bf16  per-row-tap weight slabs, K ordered (dj, c)
    b_ref:  [1, Cout]       f32
    o_ref:  [TILE_M, Cout]  bf16  TILE_M = TILE_H * W flattened output pixels
    """
    Hp, Wp, C = xp_ref.shape
    TILE_M, Cout = o_ref.shape
    W = Wp - 2
    TILE_H = TILE_M // W
    K = 3 * C

    h0 = pl.multiple_of(pl.program_id(1) * TILE_H, TILE_H)
    # Row slab covering this tile plus its 1-row halo; every tap slice below
    # is static.
    slab = xp_ref[pl.ds(h0, TILE_H + 2)]              # [TILE_H+2, Wp, C]

    acc = None
    for di in range(3):                               # 3 row taps
        rows = slab[di:di + TILE_H]                   # [TILE_H, Wp, C]
        # Lane-concat of the 3 width-shifted reads -> contraction depth 3C.
        # TODO(synk): the dj=1,2 reads start sublane-misaligned; pltpu.roll
        # along W (XLU slot) is the cheaper alternative on VALU-bound shapes.
        patch = jnp.concatenate(
            [rows[:, dj:dj + W, :] for dj in range(3)], axis=-1
        )                                             # [TILE_H, W, 3C]
        # Collapse leading dims only (layout-free when W % 8 == 0).
        part = jnp.dot(
            patch.reshape(TILE_M, K), w_ref[di],
            preferred_element_type=jnp.float32,
        )                                             # [TILE_M, Cout] f32
        if di == 0:
            acc = part + b_ref[...]    # bias folded into the accumulator init
        else:
            acc = acc + part
    # TODO(synk): on v7x, pltpu.matmul_push_rhs/acc_lhs into a single MRB
    # address would absorb the two cross-tap f32 adds for free.
    o_ref[...] = jnp.maximum(acc, 0.0).astype(o_ref.dtype)


def _pick_tile_h(H, W, target_rows=256):
    """Largest divisor of H with TILE_H*W <= ~256 rows and sublane-aligned
    row-tiles; falls back to the full extent (always a legal full-dim block)."""
    cands = [
        th
        for th in range(1, H + 1)
        if H % th == 0 and th * W <= max(target_rows, W) and (th * W) % 8 == 0
    ]
    return max(cands) if cands else H


@jax.jit
def conv3x3_relu_pallas(x, weight, bias):
    """3x3 'SAME' conv (stride 1) + bias + ReLU.

    x: NHWC f32, weight: OIHW f32, bias: [Cout] f32.  Returns NHWC bf16.
    """
    N, H, W, C = x.shape
    Cout, Cin, KH, KW = weight.shape
    assert Cin == C and KH == 3 and KW == 3

    # ---- cheap layout glue only: 1-pixel zero halo + bf16 cast, no im2col ---
    xp = jnp.pad(x, ((0, 0), (1, 1), (1, 1), (0, 0))).astype(jnp.bfloat16)
    Hp, Wp = H + 2, W + 2
    # OIHW -> [KH, KW*Cin, Cout] so that w_r[di, dj*C + c, o] == weight[o, c, di, dj]
    w_r = (
        jnp.transpose(weight, (2, 3, 1, 0)).reshape(KH, KW * C, Cout)
    ).astype(jnp.bfloat16)
    b_r = bias.astype(jnp.float32).reshape(1, Cout)

    TILE_H = _pick_tile_h(H, W)
    TILE_M = TILE_H * W
    grid = (N, H // TILE_H)

    flops = 2 * N * H * W * C * KH * KW * Cout
    bytes_accessed = (
        xp.size * 2 + w_r.size * 2 + b_r.size * 4 + N * H * W * Cout * 2
    )

    # Real VMEM footprint: double-buffered input block + output tile + weights.
    in_block_bytes = Hp * Wp * C * 2
    out_block_bytes = TILE_M * Cout * 2
    footprint = 2 * in_block_bytes + 2 * out_block_bytes + w_r.size * 2 + b_r.size * 4
    vmem_limit = int(min(56 * 2**20, max(32 * 2**20, 2 * footprint)))

    # TODO(synk): for images whose padded NHWC slab does not fit VMEM (v7x 64
    # MiB), halo-tile the H axis with overlapping manual DMA instead of a
    # whole-image block per batch element.
    out = pl.pallas_call(
        _conv3x3_kernel,
        out_shape=jax.ShapeDtypeStruct((N, H * W, Cout), jnp.bfloat16),
        grid_spec=pltpu.PrefetchScalarGridSpec(
            num_scalar_prefetch=0,
            grid=grid,
            in_specs=[
                # whole padded image of batch n; block index constant across hb
                # so it stays resident in VMEM for all row tiles of that image.
                pl.BlockSpec((None, Hp, Wp, C), lambda n, hb: (n, 0, 0, 0)),
                pl.BlockSpec((KH, KW * C, Cout), lambda n, hb: (0, 0, 0)),
                pl.BlockSpec((1, Cout), lambda n, hb: (0, 0)),
            ],
            out_specs=pl.BlockSpec((None, TILE_M, Cout), lambda n, hb: (n, hb, 0)),
        ),
        compiler_params=pltpu.CompilerParams(
            # n parallel (megacore shards batches), hb arbitrary so both cores
            # do not each hold / re-DMA the same per-n image block.
            dimension_semantics=("parallel", "arbitrary"),
            vmem_limit_bytes=vmem_limit,
        ),
        cost_estimate=pl.CostEstimate(
            flops=flops, transcendentals=0, bytes_accessed=bytes_accessed
        ),
    )(xp, w_r, b_r)

    # (N, H*W, Cout) -> (N, H, W, Cout): metadata-only reshape, no extra pass.
    return out.reshape(N, H, W, Cout)


# --------------------------------------------------------------------------
# A small "rich IO" model: takes {"image": NHWC tensor}, returns {"out": NHWC}
# --------------------------------------------------------------------------
class ConvModel:
    def __init__(self, cin=4, cout=8):
        kw = jax.random.PRNGKey(0)
        k1, k2 = jax.random.split(kw)
        self.weight = jax.random.normal(k1, (cout, cin, 3, 3), jnp.float32) * 0.1
        self.bias = jax.random.normal(k2, (cout,), jnp.float32) * 0.1

    def __call__(self, inputs):
        x = inputs["image"]                       # NHWC
        y = conv3x3_relu_pallas(x, self.weight, self.bias)
        return {"out": y}


# --------------------------------------------------------------------------
# TracingAdapter (JAX port)
# --------------------------------------------------------------------------
class TracingAdapter:
    flattened_inputs: Tuple[Any, ...] = None
    inputs_schema: Schema = None
    outputs_schema: Schema = None

    def __init__(self, model, inputs, inference_func: Optional[Callable] = None,
                 allow_non_tensor: bool = False):
        self.model = model
        if not isinstance(inputs, tuple):
            inputs = (inputs,)
        self.inputs = inputs
        self.allow_non_tensor = allow_non_tensor
        if inference_func is None:
            inference_func = lambda model, *inputs: model(*inputs)
        self.inference_func = inference_func

        self.flattened_inputs, self.inputs_schema = flatten_to_tuple(inputs)
        if all(isinstance(x, jnp.ndarray) for x in self.flattened_inputs):
            return
        if self.allow_non_tensor:
            self.flattened_inputs = tuple(
                x for x in self.flattened_inputs if isinstance(x, jnp.ndarray)
            )
            self.inputs_schema = None
        else:
            for inp in self.flattened_inputs:
                if not isinstance(inp, jnp.ndarray):
                    raise ValueError(
                        f"Inputs for tracing must only contain tensors. Got {type(inp)}."
                    )

    def forward(self, *args):
        # (torch.no_grad / patch_builtin_len are PyTorch-tracing specifics; no JAX analogue)
        if self.inputs_schema is not None:
            inputs_orig_format = self.inputs_schema(args)
        else:
            if len(args) != len(self.flattened_inputs) or any(
                x is not y for x, y in zip(args, self.flattened_inputs)
            ):
                raise ValueError(
                    "TracingAdapter does not contain valid inputs_schema."
                )
            inputs_orig_format = self.inputs

        outputs = self.inference_func(self.model, *inputs_orig_format)
        flattened_outputs, schema = flatten_to_tuple(outputs)
        flattened_output_tensors = tuple(
            x for x in flattened_outputs if isinstance(x, jnp.ndarray)
        )
        if len(flattened_output_tensors) < len(flattened_outputs):
            if self.allow_non_tensor:
                flattened_outputs = flattened_output_tensors
                self.outputs_schema = None
            else:
                raise ValueError("Model outputs cannot all flatten to tensors.")
        elif self.outputs_schema is None:
            self.outputs_schema = schema
        else:
            assert self.outputs_schema == schema
        return flattened_outputs

    __call__ = forward


# --------------------------------------------------------------------------
if __name__ == "__main__":
    key = jax.random.PRNGKey(0)
    x = jax.random.normal(key, (2, 16, 16, 4), jnp.float32)   # NHWC

    model = ConvModel(cin=4, cout=8)
    inputs = {"image": x}                      # rich (dict) input structure
    adapter = TracingAdapter(model, inputs)

    # Call with the flattened tuple of tensors, as torch.jit.trace would.
    flat_out = adapter(*adapter.flattened_inputs)
    flat_out = jax.block_until_ready(flat_out)

    # Rebuild rich output via the recorded schema and verify against a lax
    # reference computed with the same bf16-rounded operands (kernel uses bf16
    # inputs with f32 accumulation and a bf16 output store).
    rich_out = adapter.outputs_schema(flat_out)
    xq = x.astype(jnp.bfloat16).astype(jnp.float32)
    wq = model.weight.astype(jnp.bfloat16).astype(jnp.float32)        # OIHW
    w_hwio = jnp.transpose(wq, (2, 3, 1, 0))
    ref = lax.conv_general_dilated(
        xq, w_hwio, (1, 1), "SAME",
        dimension_numbers=("NHWC", "HWIO", "NHWC"),
        precision=lax.Precision.HIGHEST,
    ) + model.bias.reshape(1, 1, 1, -1)
    ref = jnp.maximum(ref, 0.0)

    got = rich_out["out"].astype(jnp.float32)
    assert rich_out["out"].shape == (2, 16, 16, 8)
    assert jnp.allclose(got, ref, atol=3e-2, rtol=3e-2), (
        float(jnp.max(jnp.abs(got - ref)))
    )

    print("KERNEL_OK")
</pallas_src>

<mosaic_0001>
module attributes {stable_mosaic.version = 11 : i64} {
  func.func @_conv3x3_kernel(%arg0: i32, %arg1: i32, %arg2: memref<1x18x18x4xbf16, #tpu.memory_space<vmem>>, %arg3: memref<3x12x8xbf16, #tpu.memory_space<vmem>>, %arg4: memref<1x8xf32, #tpu.memory_space<vmem>>, %arg5: memref<1x256x8xbf16, #tpu.memory_space<vmem>>) attributes {dimension_semantics = [#tpu.dimension_semantics<parallel>, #tpu.dimension_semantics<arbitrary>], iteration_bounds = array<i64: 2, 1>, scalar_prefetch = 0 : i64, scratch_operands = 0 : i64, tpu.core_type = #tpu.core_type<tc>, window_params = [{transform_indices = @transform_0, window_bounds = array<i64: 1, 18, 18, 4>}, {pipeline_mode = #tpu.pipeline_mode<synchronous>, transform_indices = @transform_1, window_bounds = array<i64: 3, 12, 8>}, {pipeline_mode = #tpu.pipeline_mode<synchronous>, transform_indices = @transform_2, window_bounds = array<i64: 1, 8>}, {transform_indices = @transform_3, window_bounds = array<i64: 1, 256, 8>}]} {
    %c16_i32 = arith.constant 16 : i32
    %0 = arith.muli %arg1, %c16_i32 : i32
    %1 = tpu.assume_multiple %0, 16 : i32
    %c0 = arith.constant 0 : index
    %2 = arith.index_cast %1 : i32 to index
    %c0_0 = arith.constant 0 : index
    %c0_1 = arith.constant 0 : index
    %3 = vector.load %arg2[%c0, %2, %c0_0, %c0_1] : memref<1x18x18x4xbf16, #tpu.memory_space<vmem>>, vector<1x18x18x4xbf16>
    %4 = vector.shape_cast %3 : vector<1x18x18x4xbf16> to vector<18x18x4xbf16>
    %5 = vector.extract_strided_slice %4 {offsets = [0, 0, 0], sizes = [16, 18, 4], strides = [1, 1, 1]} : vector<18x18x4xbf16> to vector<16x18x4xbf16>
    %6 = vector.extract_strided_slice %5 {offsets = [0, 0, 0], sizes = [16, 16, 4], strides = [1, 1, 1]} : vector<16x18x4xbf16> to vector<16x16x4xbf16>
    %7 = vector.extract_strided_slice %5 {offsets = [0, 1, 0], sizes = [16, 16, 4], strides = [1, 1, 1]} : vector<16x18x4xbf16> to vector<16x16x4xbf16>
    %8 = vector.extract_strided_slice %5 {offsets = [0, 2, 0], sizes = [16, 16, 4], strides = [1, 1, 1]} : vector<16x18x4xbf16> to vector<16x16x4xbf16>
    %9 = tpu.concatenate %6, %7, %8 in 2 : vector<16x16x4xbf16>, vector<16x16x4xbf16>, vector<16x16x4xbf16> -> vector<16x16x12xbf16>
    %10 = vector.shape_cast %9 : vector<16x16x12xbf16> to vector<256x12xbf16>
    %c0_2 = arith.constant 0 : index
    %c0_3 = arith.constant 0 : index
    %c0_4 = arith.constant 0 : index
    %11 = vector.load %arg3[%c0_2, %c0_3, %c0_4] : memref<3x12x8xbf16, #tpu.memory_space<vmem>>, vector<1x12x8xbf16>
    %12 = vector.shape_cast %11 : vector<1x12x8xbf16> to vector<12x8xbf16>
    %cst = arith.constant dense<0.000000e+00> : vector<256x8xf32>
    %13 = tpu.matmul %10, %12, %cst {dimension_numbers = #tpu.dot_dimension_numbers<[1], [0], [0], [1], [0, 0, 1, 1], [], []>} : vector<256x12xbf16>, vector<12x8xbf16>, vector<256x8xf32> -> vector<256x8xf32>
    %c0_5 = arith.constant 0 : index
    %c0_6 = arith.constant 0 : index
    %14 = vector.load %arg4[%c0_5, %c0_6] : memref<1x8xf32, #tpu.memory_space<vmem>>, vector<1x8xf32>
    %15 = vector.broadcast %14 : vector<1x8xf32> to vector<256x8xf32>
    %16 = arith.addf %13, %15 : vector<256x8xf32>
    %17 = vector.extract_strided_slice %4 {offsets = [1, 0, 0], sizes = [16, 18, 4], strides = [1, 1, 1]} : vector<18x18x4xbf16> to vector<16x18x4xbf16>
    %18 = vector.extract_strided_slice %17 {offsets = [0, 0, 0], sizes = [16, 16, 4], strides = [1, 1, 1]} : vector<16x18x4xbf16> to vector<16x16x4xbf16>
    %19 = vector.extract_strided_slice %17 {offsets = [0, 1, 0], sizes = [16, 16, 4], strides = [1, 1, 1]} : vector<16x18x4xbf16> to vector<16x16x4xbf16>
    %20 = vector.extract_strided_slice %17 {offsets = [0, 2, 0], sizes = [16, 16, 4], strides = [1, 1, 1]} : vector<16x18x4xbf16> to vector<16x16x4xbf16>
    %21 = tpu.concatenate %18, %19, %20 in 2 : vector<16x16x4xbf16>, vector<16x16x4xbf16>, vector<16x16x4xbf16> -> vector<16x16x12xbf16>
    %22 = vector.shape_cast %21 : vector<16x16x12xbf16> to vector<256x12xbf16>
    %c1 = arith.constant 1 : index
    %c0_7 = arith.constant 0 : index
    %c0_8 = arith.constant 0 : index
    %23 = vector.load %arg3[%c1, %c0_7, %c0_8] : memref<3x12x8xbf16, #tpu.memory_space<vmem>>, vector<1x12x8xbf16>
    %24 = vector.shape_cast %23 : vector<1x12x8xbf16> to vector<12x8xbf16>
    %cst_9 = arith.constant dense<0.000000e+00> : vector<256x8xf32>
    %25 = tpu.matmul %22, %24, %cst_9 {dimension_numbers = #tpu.dot_dimension_numbers<[1], [0], [0], [1], [0, 0, 1, 1], [], []>} : vector<256x12xbf16>, vector<12x8xbf16>, vector<256x8xf32> -> vector<256x8xf32>
    %26 = arith.addf %16, %25 : vector<256x8xf32>
    %27 = vector.extract_strided_slice %4 {offsets = [2, 0, 0], sizes = [16, 18, 4], strides = [1, 1, 1]} : vector<18x18x4xbf16> to vector<16x18x4xbf16>
    %28 = vector.extract_strided_slice %27 {offsets = [0, 0, 0], sizes = [16, 16, 4], strides = [1, 1, 1]} : vector<16x18x4xbf16> to vector<16x16x4xbf16>
    %29 = vector.extract_strided_slice %27 {offsets = [0, 1, 0], sizes = [16, 16, 4], strides = [1, 1, 1]} : vector<16x18x4xbf16> to vector<16x16x4xbf16>
    %30 = vector.extract_strided_slice %27 {offsets = [0, 2, 0], sizes = [16, 16, 4], strides = [1, 1, 1]} : vector<16x18x4xbf16> to vector<16x16x4xbf16>
    %31 = tpu.concatenate %28, %29, %30 in 2 : vector<16x16x4xbf16>, vector<16x16x4xbf16>, vector<16x16x4xbf16> -> vector<16x16x12xbf16>
    %32 = vector.shape_cast %31 : vector<16x16x12xbf16> to vector<256x12xbf16>
    %c2 = arith.constant 2 : index
    %c0_10 = arith.constant 0 : index
    %c0_11 = arith.constant 0 : index
    %33 = vector.load %arg3[%c2, %c0_10, %c0_11] : memref<3x12x8xbf16, #tpu.memory_space<vmem>>, vector<1x12x8xbf16>
    %34 = vector.shape_cast %33 : vector<1x12x8xbf16> to vector<12x8xbf16>
    %cst_12 = arith.constant dense<0.000000e+00> : vector<256x8xf32>
    %35 = tpu.matmul %32, %34, %cst_12 {dimension_numbers = #tpu.dot_dimension_numbers<[1], [0], [0], [1], [0, 0, 1, 1], [], []>} : vector<256x12xbf16>, vector<12x8xbf16>, vector<256x8xf32> -> vector<256x8xf32>
    %36 = arith.addf %26, %35 : vector<256x8xf32>
    %cst_13 = arith.constant 0.000000e+00 : f32
    %37 = vector.broadcast %cst_13 : f32 to vector<256x8xf32>
    %38 = arith.maximumf %36, %37 : vector<256x8xf32>
    %39 = arith.truncf %38 : vector<256x8xf32> to vector<256x8xbf16>
    %c0_14 = arith.constant 0 : index
    %c0_15 = arith.constant 0 : index
    %c0_16 = arith.constant 0 : index
    %40 = vector.load %arg5[%c0_14, %c0_15, %c0_16] : memref<1x256x8xbf16, #tpu.memory_space<vmem>>, vector<1x256x8xbf16>
    %41 = vector.shape_cast %40 : vector<1x256x8xbf16> to vector<256x8xbf16>
    %42 = vector.shape_cast %39 : vector<256x8xbf16> to vector<1x256x8xbf16>
    tpu.vector_store %arg5[%c0_14, %c0_15, %c0_16], %42 {strides = array<i32>} : memref<1x256x8xbf16, #tpu.memory_space<vmem>>, vector<1x256x8xbf16>,
    return
  }
  func.func @transform_0(%arg0: i32, %arg1: i32) -> (i32, i32, i32, i32) {
    %c0_i32 = arith.constant 0 : i32
    %c0_i32_0 = arith.constant 0 : i32
    %c0_i32_1 = arith.constant 0 : i32
    %c0_i32_2 = arith.constant 0 : i32
    return %arg0, %c0_i32, %c0_i32_0, %c0_i32_1 : i32, i32, i32, i32
  }
  func.func @transform_1(%arg0: i32, %arg1: i32) -> (i32, i32, i32) {
    %c0_i32 = arith.constant 0 : i32
    %c0_i32_0 = arith.constant 0 : i32
    %c0_i32_1 = arith.constant 0 : i32
    %c0_i32_2 = arith.constant 0 : i32
    return %c0_i32, %c0_i32_0, %c0_i32_1 : i32, i32, i32
  }
  func.func @transform_2(%arg0: i32, %arg1: i32) -> (i32, i32) {
    %c0_i32 = arith.constant 0 : i32
    %c0_i32_0 = arith.constant 0 : i32
    %c0_i32_1 = arith.constant 0 : i32
    return %c0_i32, %c0_i32_0 : i32, i32
  }
  func.func @transform_3(%arg0: i32, %arg1: i32) -> (i32, i32, i32) {
    %c0_i32 = arith.constant 0 : i32
    %c0_i32_0 = arith.constant 0 : i32
    return %arg0, %arg1, %c0_i32 : i32, i32, i32
  }
}

</mosaic_0001>

<bundles_post_ra>
// kernel: conv3x3_relu_pallas.1
= control target key start
LH: loop header
LB: loop body
LE: loop exit
PB: predicated region body
PF: predicated region fallthrough
CT: control target
= control target key end

     0   :  { %s2153_s12 = smov 0   ;;  %s2155_s13 = smov 0   ;;  %s2750_s0 = inlined_call_operand.vmem [shape: bf16[2,18,18,4], index: 0, kind: input, shape index: {}]   ;;  %s2751_s1 = inlined_call_operand.vmem [shape: bf16[3,12,8], index: 1, kind: input, shape index: {}]   ;;  %s2752_s2 = inlined_call_operand.vmem [shape: f32[1,8], index: 2, kind: input, shape index: {}]   ;;  %s2753_s3 = inlined_call_operand.vmem [shape: bf16[2,256,8], index: 3, kind: output, shape index: {}]  }
   0x1   :  { %s2157_s14 = smov 0  }
   0x2 LB: > { %s25_s15 = sadd.s32 1, %s2125_s13  ;;  %p1719_p0 = scmp.ge.s32.totalorder %s2129_s14, 1  ;;  %s2129_s14 = sphi %s2157_s14, %s13_s14   ;;  %s2125_s13 = sphi %s2155_s13, %s2755_s13   ;;  %s2121_s12 = sphi %s2153_s12, %s2754_s12  }
   0x3   : > { %p27_p1 = scmp.ge.s32.totalorder %s25_s15, 2  ;;  %p151_p2 = scmp.lt.s32.totalorder %s2129_s14, 3 }
   0x5   : > { %s2757_s15 = smov (%p27_p1, %s25_s15), 0  ;;  %p152_p3 = pnand %p1719_p0, %p151_p2 }
   0x6   : > { %p179_p4 = scmp.lt.s32.totalorder (!%p152_p3), %s2121_s12, 1  ;;  %s2131_s20 = smov (!%p152_p3), 8  }
   0x7   : > { %155 = sbr.rel (%p152_p3) target bundleno = 467 (0x1d3), region = 32  ;;  %s2132_s21 = smov (!%p152_p3), 4  }
   0xc   : > { %s2759_s12 = smov (!%p179_p4, %s2121_s12), 1  ;;  %vm606_vm0 = vcmask 1046528   ;;  %vm381_vm1 = vsmask.f32 7424  ;;  %vm800_vm2 = vcmask 1045504   ;;  %vm687_vm3 = vcmask 31744  }
   0xd   : > { %s2041_s16 = smul.u32 216, %s2759_s12  ;;  %vm720_vm4 = vcmask 64512   ;;  %vm767_vm5 = vcmask 97280   ;;  %s1849_s30 = sshll.u32 %s2759_s12, 7  ;;  %vm1599_vm6 = vcmask 60416  }
   0xe   : > { %s2624_s6 = scalar_lea.vmem %s2753_s3, %s1849_s30 }
   0xf   : > { %s2177_s19 = scalar_lea.vmem %s2750_s0, %s2041_s16 }
  0x10   : > { %v2180_v0 = vld [vmem:[%s2177_s19 + $0x6c] sm:$0xff]   ;;  %v2069_v1 = vld [vmem:[%s2177_s19 + $0x74] ss:$0 sps:$4 sm:$0x11]   ;;  %v2184_v2 = vld [vmem:[%s2177_s19 + $0x60] sm:$0xff]  }
  0x11   : > { %v634_v3 = vrot.slane %v2180_v0, 1  ;;  %v635_v4 = vrot.slane %v2069_v1, 1  ;;  %v2071_v5 = vld [vmem:[%s2177_s19 + $0x68] ss:$0 sps:$4 sm:$0x11]   ;;  %v2189_v6 = vld [vmem:[%s2177_s19 + $0xc] sm:$0xff]  }
  0x12   : > { %v631_v7 = vrot.slane %v2184_v2, 1  ;;  %v2193_v8 = vld [vmem:[%s2177_s19] sm:$0xff]   ;;  %v632_v10 = vrot.slane %v2071_v5, 1  ;;  %v2073_v11 = vld [vmem:[%s2177_s19 + $0x14] ss:$0 sps:$4 sm:$0x11]  }
  0x13   : > { %v636_v9 = vsel %vm606_vm0, %v634_v3, %v635_v4  ;;  %v610_v12 = vrot.slane %v2189_v6, 1  ;;  %v607_v13 = vrot.slane %v2193_v8, 1  ;;  %v611_v15 = vrot.slane %v2073_v11, 1  ;;  %v2075_v16 = vld [vmem:[%s2177_s19 + $0x8] ss:$0 sps:$4 sm:$0x11]  }
  0x14   : > { %673 = vrot.lane.b32.xlu0 %v636_v9, %s2131_s20  ;;  %v633_v14 = vsel %vm606_vm0, %v631_v7, %v632_v10  ;;  %v479_v17 = vshrl.u32 %v2184_v2, 16  ;;  %v481_v18 = vshll.u32 %v2184_v2, 16  ;;  %v486_v19 = vshll.u32 %v2071_v5, 16  ;;  %v2209_v25 = vld [vmem:[%s2177_s19 + $0x78] sm:$0xff]   ;;  %v2222_v39 = vld [vmem:[%s2177_s19 + $0x84] sm:$0xff]   ;;  %v2248_v10 = vld [vmem:[%s2177_s19 + $0x90] sm:$0xff]  }
  0x15   : > { %671 = vrot.lane.b32.xlu1 %v633_v14, %s2131_s20  ;;  %v383_v20 = vshrl.u32 %v2193_v8, 16  ;;  %v612_v21 = vsel %vm606_vm0, %v610_v12, %v611_v15  ;;  %v608_v22 = vrot.slane %v2075_v16, 1  ;;  %v385_v23 = vshll.u32 %v2193_v8, 16  ;;  %v2215_v34 = vld [vmem:[%s2177_s19 + $0x80] ss:$0 sps:$4 sm:$0x11]  }
  0x16   : > { %v390_v24 = vshll.u32 %v2075_v16, 16  ;;  %v483_v26 = vrot.slane %v481_v18, 1  ;;  %v488_v27 = vrot.slane %v486_v19, 1  ;;  %v491_v28 = vshrl.u32 %v2180_v0, 16  ;;  %v2226_v44 = vld [vmem:[%s2177_s19 + $0x18] sm:$0xff]   ;;  %v2243_v4 = vld [vmem:[%s2177_s19 + $0x24] sm:$0xff]  }
  0x17   : > { %v493_v29 = vshll.u32 %v2180_v0, 16  ;;  %v609_v30 = vsel %vm606_vm0, %v607_v13, %v608_v22  ;;  %v387_v31 = vrot.slane %v385_v23, 1  ;;  %v498_v33 = vshll.u32 %v2069_v1, 16  ;;  %v2079_v52 = vld [vmem:[%s2177_s19 + $0x8c] ss:$0 sps:$4 sm:$0x11]  }
  0x18   : > { %v392_v32 = vrot.slane %v390_v24, 1  ;;  %655 = vrot.lane.b32.xlu0 %v609_v30, %s2131_s20  ;;  %v484_v35 = vor.u32 %v483_v26, %v479_v17  ;;  %v395_v37 = vshrl.u32 %v2189_v6, 16  ;;  %v397_v38 = vshll.u32 %v2189_v6, 16  ;;  %v2081_v3 = vld [vmem:[%s2177_s19 + $0x20] ss:$0 sps:$4 sm:$0x11]  }
  0x19   : > { %657 = vrot.lane.b32.xlu1 %v612_v21, %s2131_s20  ;;  %v495_v36 = vrot.slane %v493_v29, 1  ;;  %v388_v40 = vor.u32 %v387_v31, %v383_v20  ;;  %v500_v41 = vrot.slane %v498_v33, 1  ;;  %v402_v42 = vshll.u32 %v2073_v11, 16  ;;  %v2083_v16 = vld [vmem:[%s2177_s19 + $0x2c] ss:$0 sps:$4 sm:$0x11]  }
  0x1a   : > { %v503_v43 = vshrl.u32 %v2209_v25, 16  ;;  %v489_v45 = vsel %vm381_vm1, %v484_v35, %v488_v27  ;;  %v399_v47 = vrot.slane %v397_v38, 1  ;;  %v505_v48 = vshll.u32 %v2209_v25, 16  ;;  %v2085_v27 = vld [vmem:[%s2177_s19 + $0x98] ss:$0 sps:$4 sm:$0x11]  }
  0x1b   : > { %v496_v46 = vor.u32 %v495_v36, %v491_v28  ;;  %v393_v49 = vsel %vm381_vm1, %v388_v40, %v392_v32  ;;  %v404_v50 = vrot.slane %v402_v42, 1  ;;  %v510_v51 = vshll.u32 %v2215_v34, 16  ;;  %v2266_v33 = vld [vmem:[%s2177_s19 + $0x9c] sm:$0xff]   ;;  %v2275_v42 = vld [vmem:[%s2177_s19 + $0x30] sm:$0xff]  }
  0x1c   : > { %v515_v53 = vshrl.u32 %v2222_v39, 16  ;;  %590 = vrot.lane.b32.xlu0 %v489_v45, %s2132_s21  ;;  %v400_v54 = vor.u32 %v399_v47, %v395_v37  ;;  %v507_v55 = vrot.slane %v505_v48, 1  ;;  %v517_v56 = vshll.u32 %v2222_v39, 16  ;;  %v2270_v37 = vld [vmem:[%s2177_s19 + $0xa4] ss:$0 sps:$4 sm:$0x11]  }
  0x1d   : > { %574 = vrot.lane.b32.xlu1 %v393_v49, %s2132_s21  ;;  %v501_v57 = vsel %vm381_vm1, %v496_v46, %v500_v41  ;;  %v512_v58 = vrot.slane %v510_v51, 1  ;;  %v522_v59 = vshll.u32 %v2079_v52, 16  ;;  %v637_v60 = vrot.slane %v2209_v25, 1 }
  0x1e   : > { %v405_v61 = vsel %vm381_vm1, %v400_v54, %v404_v50  ;;  %v508_v62 = vor.u32 %v507_v55, %v503_v43  ;;  %v519_v63 = vrot.slane %v517_v56, 1  ;;  %v638_v1 = vrot.slane %v2215_v34, 1  ;;  %v2284_v50 = vld [vmem:[%s2177_s19 + $0x38] ss:$0 sps:$4 sm:$0x11]  }
  0x1f   : > { %v524_v5 = vrot.slane %v522_v59, 1  ;;  %v407_v7 = vshrl.u32 %v2226_v44, 16  ;;  %v409_v9 = vshll.u32 %v2226_v44, 16  ;;  %v414_v12 = vshll.u32 %v2081_v3, 16 }
  0x20   : > { %592 = vrot.lane.b32.xlu0 %v501_v57, %s2132_s21  ;;  %v520_v11 = vor.u32 %v519_v63, %v515_v53  ;;  %v640_v13 = vrot.slane %v2222_v39, 1  ;;  %v513_v14 = vsel %vm381_vm1, %v508_v62, %v512_v58  ;;  %v419_v17 = vshrl.u32 %v2243_v4, 16  ;;  %v2297_v58 = vld [vmem:[%s2177_s19 + $0x44] ss:$0 sps:$4 sm:$0x11]  }
  0x21   : > { %576 = vrot.lane.b32.xlu1 %v405_v61, %s2132_s21  ;;  %v411_v15 = vrot.slane %v409_v9, 1  ;;  %v421_v18 = vshll.u32 %v2243_v4, 16  ;;  %v416_v20 = vrot.slane %v414_v12, 1  ;;  %v641_v21 = vrot.slane %v2079_v52, 1  ;;  %v2288_v52 = vld [vmem:[%s2177_s19 + $0x3c] sm:$0xff]  }
  0x22   : > { %v525_v19 = vsel %vm381_vm1, %v520_v11, %v524_v5  ;;  %v426_v24 = vshll.u32 %v2083_v16, 16  ;;  %v613_v26 = vrot.slane %v2226_v44, 1  ;;  %v529_v28 = vshll.u32 %v2248_v10, 16 }
  0x23   : > { %v412_v22 = vor.u32 %v411_v15, %v407_v7  ;;  %v423_v23 = vrot.slane %v421_v18, 1  ;;  %v639_v29 = vsel %vm606_vm0, %v637_v60, %v638_v1  ;;  %v614_v34 = vrot.slane %v2081_v3, 1  ;;  %v2303_v7 = vld [vmem:[%s2177_s19 + $0xa8] sm:$0xff]   ;;  %v2315_v18 = vld [vmem:[%s2177_s19 + $0xb4] sm:$0xff]  }
  0x24   : > { %594 = vrot.lane.b32.xlu0 %v513_v14, %s2132_s21  ;;  %v428_v32 = vrot.slane %v426_v24, 1  ;;  %v616_v35 = vrot.slane %v2243_v4, 1  ;;  %v617_v36 = vrot.slane %v2083_v16, 1  ;;  %v527_v38 = vshrl.u32 %v2248_v10, 16 }
  0x25   : > { %596 = vrot.lane.b32.xlu1 %v525_v19, %s2132_s21  ;;  %v417_v30 = vsel %vm381_vm1, %v412_v22, %v416_v20  ;;  %v424_v31 = vor.u32 %v423_v23, %v419_v17  ;;  %v531_v40 = vrot.slane %v529_v28, 1  ;;  %v541_v41 = vshll.u32 %v2266_v33, 16  ;;  %v2311_v16 = vld [vmem:[%s2177_s19 + $0xb0] ss:$0 sps:$4 sm:$0x11]  }
  0x26   : > { %v642_v43 = vsel %vm606_vm0, %v640_v13, %v641_v21  ;;  %v534_v45 = vshll.u32 %v2085_v27, 16  ;;  %v539_v46 = vshrl.u32 %v2266_v33, 16  ;;  %v546_v49 = vshll.u32 %v2270_v37, 16  ;;  %v2318_v19 = vld [vmem:[%s2177_s19 + $0xbc] ss:$0 sps:$4 sm:$0x11]  }
  0x27   : > { %v429_v47 = vsel %vm381_vm1, %v424_v31, %v428_v32  ;;  %v543_v48 = vrot.slane %v541_v41, 1  ;;  %v433_v51 = vshll.u32 %v2275_v42, 16  ;;  %v615_v53 = vsel %vm606_vm0, %v613_v26, %v614_v34  ;;  %v2334_v34 = vld [vmem:[%s2177_s19 + $0x50] ss:$0 sps:$4 sm:$0x11]  }
  0x28   : > { %675 = vrot.lane.b32.xlu0 %v639_v29, %s2131_s20  ;;  %v431_v54 = vshrl.u32 %v2275_v42, 16  ;;  %v618_v55 = vsel %vm606_vm0, %v616_v35, %v617_v36  ;;  %v438_v57 = vshll.u32 %v2284_v50, 16  ;;  %v445_v59 = vshll.u32 %v2288_v52, 16 }
  0x29   : > { %578 = vrot.lane.b32.xlu1 %v417_v30, %s2132_s21  ;;  %v435_v56 = vrot.slane %v433_v51, 1  ;;  %v532_v60 = vor.u32 %v531_v40, %v527_v38  ;;  %v536_v61 = vrot.slane %v534_v45, 1  ;;  %v544_v62 = vor.u32 %v543_v48, %v539_v46  ;;  %v2347_v48 = vld [vmem:[%s2177_s19 + $0x54] sm:$0xff]  }
  0x2a   : > { %v548_v63 = vrot.slane %v546_v49, 1  ;;  %v643_v1 = vrot.slane %v2248_v10, 1  ;;  %v644_v3 = vrot.slane %v2085_v27, 1  ;;  %v443_v5 = vshrl.u32 %v2288_v52, 16  ;;  %v2328_v27 = vld [vmem:[%s2177_s19 + $0x48] sm:$0xff]  }
  0x2b   : > { %v436_v9 = vor.u32 %v435_v56, %v431_v54  ;;  %v440_v11 = vrot.slane %v438_v57, 1  ;;  %v447_v12 = vrot.slane %v445_v59, 1  ;;  %v537_v13 = vsel %vm381_vm1, %v532_v60, %v536_v61  ;;  %v2352_v54 = vld [vmem:[%s2177_s19 + $0xc0] sm:$0xff]   ;;  %v2355_v56 = vld [vmem:[%s2177_s19 + $0x5c] ss:$0 sps:$4 sm:$0x11]  }
  0x2c   : > { %677 = vrot.lane.b32.xlu0 %v642_v43, %s2131_s20  ;;  %v549_v14 = vsel %vm381_vm1, %v544_v62, %v548_v63  ;;  %v450_v15 = vshll.u32 %v2297_v58, 16  ;;  %v553_v17 = vshll.u32 %v2303_v7, 16  ;;  %v645_v20 = vsel %vm606_vm0, %v643_v1, %v644_v3  ;;  %v2358_v57 = vld [vmem:[%s2177_s19 + $0xc8] ss:$0 sps:$4 sm:$0x11]  }
  0x2d   : > { %580 = vrot.lane.b32.xlu1 %v429_v47, %s2132_s21  ;;  %v565_v21 = vshll.u32 %v2315_v18, 16  ;;  %v441_v22 = vsel %vm381_vm1, %v436_v9, %v440_v11  ;;  %v646_v23 = vrot.slane %v2266_v33, 1  ;;  %v647_v24 = vrot.slane %v2270_v37, 1  ;;  %v2104_v1 = vld [vmem:[%s2751_s1] sm:$0x3f]   ;;  %v2374_v11 = vld [vmem:[%s2177_s19 + $0xcc] sm:$0xff]  }
  0x2e   : > { %v448_v26 = vor.u32 %v447_v12, %v443_v5  ;;  %v452_v28 = vrot.slane %v450_v15, 1  ;;  %v551_v29 = vshrl.u32 %v2303_v7, 16  ;;  %v555_v30 = vrot.slane %v553_v17, 1  ;;  %v2103_v12 = vld [vmem:[%s2177_s19 + $0xd4] ss:$0 sps:$4 sm:$0x11]   ;;  %2037 = vmatprep.subr.msk.bf16.mxu0 %vm800_vm2, %v2104_v1  ;;  %2038 = vmatprep.subr.msk.bf16.mxu1 %vm800_vm2, %v2104_v1 }
  0x2f   : > { %v558_v31 = vshll.u32 %v2311_v16, 16  ;;  %v570_v32 = vshll.u32 %v2318_v19, 16  ;;  %v619_v35 = vrot.slane %v2275_v42, 1  ;;  %v620_v36 = vrot.slane %v2284_v50, 1 }
  0x30   : > { %659 = vrot.lane.b32.xlu0 %v615_v53, %s2131_s20  ;;  %v563_v37 = vshrl.u32 %v2315_v18, 16  ;;  %v567_v38 = vrot.slane %v565_v21, 1  ;;  %v622_v40 = vrot.slane %v2288_v52, 1  ;;  %v623_v41 = vrot.slane %v2297_v58, 1 }
  0x31   : > { %661 = vrot.lane.b32.xlu1 %v618_v55, %s2131_s20  ;;  %v457_v43 = vshll.u32 %v2328_v27, 16  ;;  %v648_v45 = vsel %vm606_vm0, %v646_v23, %v647_v24  ;;  %v453_v46 = vsel %vm381_vm1, %v448_v26, %v452_v28  ;;  %v560_v47 = vrot.slane %v558_v31, 1 }
  0x32   : > { %v556_v49 = vor.u32 %v555_v30, %v551_v29  ;;  %v572_v50 = vrot.slane %v570_v32, 1  ;;  %v455_v51 = vshrl.u32 %v2328_v27, 16  ;;  %v462_v53 = vshll.u32 %v2334_v34, 16 }
  0x33   : > { %v568_v55 = vor.u32 %v567_v38, %v563_v37  ;;  %v459_v58 = vrot.slane %v457_v43, 1  ;;  %v987_v59 = vrot.slane %v2352_v54, 1  ;;  %v621_v60 = vsel %vm606_vm0, %v619_v35, %v620_v36 }
  0x34   : > { %598 = vrot.lane.b32.xlu0 %v537_v13, %s2132_s21  ;;  %v624_v61 = vsel %vm606_vm0, %v622_v40, %v623_v41  ;;  %v469_v62 = vshll.u32 %v2347_v48, 16  ;;  %v988_v63 = vrot.slane %v2358_v57, 1  ;;  %v561_v3 = vsel %vm381_vm1, %v556_v49, %v560_v47 }
  0x35   : > { %600 = vrot.lane.b32.xlu1 %v549_v14, %s2132_s21  ;;  %v649_v5 = vrot.slane %v2303_v7, 1  ;;  %v650_v9 = vrot.slane %v2311_v16, 1  ;;  %v573_v13 = vsel %vm381_vm1, %v568_v55, %v572_v50  ;;  %v464_v14 = vrot.slane %v462_v53, 1  ;;  %v2106_v16 = vld [vmem:[%s2751_s1 + $0x10] sm:$0x3f]  }
  0x36   : > { %v467_v15 = vshrl.u32 %v2347_v48, 16  ;;  %v989_v17 = vsel %vm606_vm0, %v987_v59, %v988_v63  ;;  %v460_v21 = vor.u32 %v459_v58, %v455_v51  ;;  %v1224_v23 = vrot.slane %v2374_v11, 1 }
  0x37   : > { %v1225_v24 = vrot.slane %v2103_v12, 1  ;;  %v471_v26 = vrot.slane %v469_v62, 1  ;;  %v802_v28 = vsel %vm800_vm2, %v2104_v1, 0  ;;  %v2397_v30 = vsel %vm800_vm2, %v2106_v16, 0 }
  0x38   : > { %679 = vrot.lane.b32.xlu0 %v645_v20, %s2131_s20  ;;  %v2105_v20 = vld [vmem:[%s2751_s1 + $0x8] sm:$0x3f]   ;;  %1934 = vmatpush3.bf16.msra.mxu0 %v802_v28  ;;  %v651_v32 = vsel %vm606_vm0, %v649_v5, %v650_v9  ;;  %v652_v35 = vrot.slane %v2315_v18, 1  ;;  %v976_v36 = vshll.u32 %v2352_v54, 16  ;;  %v465_v37 = vsel %vm381_vm1, %v460_v21, %v464_v14 }
  0x39   : > { %582 = vrot.lane.b32.xlu1 %v441_v22, %s2132_s21  ;;  %v474_v22 = vshll.u32 %v2355_v56, 16  ;;  %v2394_v29 = vsel %vm800_vm2, %v2105_v20, 0  ;;  %v1226_v31 = vsel %vm606_vm0, %v1224_v23, %v1225_v24  ;;  %2036 = vmatpush3.bf16.msra.mxu1 %v802_v28  ;;  %v653_v38 = vrot.slane %v2318_v19, 1 }
  0x3a   : > { %2039 = vmatprep.subr.msk.bf16.mxu1 %vm800_vm2, %v2105_v20  ;;  %2040 = vmatprep.subr.msk.bf16.mxu0 %vm800_vm2, %v2106_v16  ;;  %v472_v40 = vor.u32 %v471_v26, %v467_v15  ;;  %v625_v43 = vrot.slane %v2328_v27, 1  ;;  %v629_v47 = vrot.slane %v2355_v56, 1  ;;  %v974_v49 = vshrl.u32 %v2352_v54, 16 }
  0x3b   : > { %v476_v41 = vrot.slane %v474_v22, 1  ;;  %v978_v50 = vrot.slane %v976_v36, 1  ;;  %v654_v51 = vsel %vm606_vm0, %v652_v35, %v653_v38  ;;  %v981_v53 = vshll.u32 %v2358_v57, 16 }
  0x3c   : > { %681 = vrot.lane.b32.xlu0 %v648_v45, %s2131_s20  ;;  %v626_v45 = vrot.slane %v2334_v34, 1  ;;  %v1213_v55 = vshll.u32 %v2374_v11, 16  ;;  %v1218_v62 = vshll.u32 %v2103_v12, 16 }
  0x3d   : > { %584 = vrot.lane.b32.xlu1 %v453_v46, %s2132_s21  ;;  %v628_v46 = vrot.slane %v2347_v48, 1  ;;  %v477_v19 = vsel %vm381_vm1, %v472_v40, %v476_v41  ;;  %v979_v56 = vor.u32 %v978_v50, %v974_v49  ;;  %v983_v59 = vrot.slane %v981_v53, 1 }
  0x3e   : > { %v627_v34 = vsel %vm606_vm0, %v625_v43, %v626_v45  ;;  %v1220_v1 = vrot.slane %v1218_v62, 1 }
  0x3f   : > { %v630_v58 = vsel %vm606_vm0, %v628_v46, %v629_v47  ;;  %v984_v57 = vsel %vm381_vm1, %v979_v56, %v983_v59 }
  0x40   : > { %663 = vrot.lane.b32.xlu0 %v621_v60, %s2131_s20  ;;  %v1211_v60 = vshrl.u32 %v2374_v11, 16 }
  0x41   : > { %665 = vrot.lane.b32.xlu1 %v624_v61, %s2131_s20  ;;  %v1215_v61 = vrot.slane %v1213_v55, 1 }
  0x43   : > { %v1216_v63 = vor.u32 %v1215_v61, %v1211_v60 }
  0x44   : > { %602 = vrot.lane.b32.xlu0 %v561_v3, %s2132_s21 }
  0x45   : > { %604 = vrot.lane.b32.xlu1 %v573_v13, %s2132_s21  ;;  %v1221_v3 = vsel %vm381_vm1, %v1216_v63, %v1220_v1 }
  0x48   : > { %683 = vrot.lane.b32.xlu0 %v651_v32, %s2131_s20 }
  0x49   : > { %586 = vrot.lane.b32.xlu1 %v465_v37, %s2132_s21 }
  0x4c   : > { %685 = vrot.lane.b32.xlu0 %v654_v51, %s2131_s20 }
  0x4d   : > { %588 = vrot.lane.b32.xlu1 %v477_v19, %s2132_s21 }
  0x50   : > { %667 = vrot.lane.b32.xlu0 %v627_v34, %s2131_s20 }
  0x51   : > { %669 = vrot.lane.b32.xlu1 %v630_v58, %s2131_s20 }
  0x54   : > { %985 = vrot.lane.b32.xlu0 %v984_v57, %s2132_s21 }
  0x55   : > { %990 = vrot.lane.b32.xlu1 %v989_v17, %s2131_s20 }
  0x58   : > { %1222 = vrot.lane.b32.xlu0 %v1221_v3, %s2132_s21 }
  0x59   : > { %1227 = vrot.lane.b32.xlu1 %v1226_v31, %s2131_s20 }
  0x86   : > { %v674_v5 = vpop.permute.xlu0 %673 }
  0x87   : > { %v672_v9 = vpop.permute.xlu1 %671 }
  0x8a   : > { %v656_v13 = vpop.permute.xlu0 %655 }
  0x8b   : > { %v658_v12 = vpop.permute.xlu1 %657 }
  0x8e   : > { %v591_v14 = vpop.permute.xlu0 %590 }
  0x8f   : > { %v575_v15 = vpop.permute.xlu1 %574  ;;  %v705_v20 = vsel %vm687_vm3, %v2184_v2, %v591_v14 }
  0x90   : > { %v689_v17 = vsel %vm687_vm3, %v2193_v8, %v575_v15  ;;  %v2438_v16 = vsel %vm720_vm4, %v705_v20, %v672_v9 }
  0x91   : > { %v722_v21 = vsel %vm720_vm4, %v689_v17, %v656_v13  ;;  %1951 = vmatprep.mubr.msk.bf16.mxu1 %vm767_vm5, %v2438_v16 }
  0x92   : > { %1935 = vmatprep.mubr.msk.bf16.mxu0 %vm767_vm5, %v722_v21  ;;  %v593_v22 = vpop.permute.xlu0 %592 }
  0x93   : > { %v577_v23 = vpop.permute.xlu1 %576  ;;  %v707_v24 = vsel %vm687_vm3, %v2180_v0, %v593_v22 }
  0x94   : > { %v691_v2 = vsel %vm687_vm3, %v2189_v6, %v577_v23  ;;  %v2450_v26 = vsel %vm720_vm4, %v707_v24, %v674_v5 }
  0x95   : > { %v724_v8 = vsel %vm720_vm4, %v691_v2, %v658_v12  ;;  %1952 = vmatmul.mubr.msk.bf16.vlgmr.msra.gmra.mxu1 %vm767_vm5, %v2450_v26 }
  0x96   : > { %1936 = vmatmul.mubr.msk.bf16.vlgmr.msra.gmra.mxu0 %vm767_vm5, %v724_v8  ;;  %v595_v28 = vpop.permute.xlu0 %594  ;;  %1968 = vmatpush3.bf16.msra.mxu1 %v2394_v29 }
  0x97   : > { %v597_v31 = vpop.permute.xlu1 %596  ;;  %2002 = vmatpush3.bf16.msra.mxu0 %v2397_v30  ;;  %v709_v0 = vsel %vm687_vm3, %v2209_v25, %v595_v28 }
  0x98   : > { %v711_v36 = vsel %vm687_vm3, %v2222_v39, %v597_v31 }
  0x9a   : > { %v676_v6 = vpop.permute.xlu0 %675 }
  0x9b   : > { %v579_v32 = vpop.permute.xlu1 %578  ;;  %v2460_v35 = vsel %vm720_vm4, %v709_v0, %v676_v6 }
  0x9c   : > { %1955 = vmatprep.mubr.msk.bf16.mxu1 %vm767_vm5, %v2460_v35  ;;  %v693_v25 = vsel %vm687_vm3, %v2226_v44, %v579_v32 }
  0x9e   : > { %v678_v37 = vpop.permute.xlu0 %677 }
  0x9f   : > { %v581_v38 = vpop.permute.xlu1 %580  ;;  %v2467_v29 = vsel %vm720_vm4, %v711_v36, %v678_v37 }
  0xa0   : > { %1956 = vmatmul.mubr.msk.bf16.gmra.mxu1 %vm767_vm5, %v2467_v29  ;;  %v695_v30 = vsel %vm687_vm3, %v2243_v4, %v581_v38 }
  0xa2   : > { %v660_v40 = vpop.permute.xlu0 %659 }
  0xa3   : > { %v662_v41 = vpop.permute.xlu1 %661  ;;  %v726_v43 = vsel %vm720_vm4, %v693_v25, %v660_v40 }
  0xa4   : > { %v728_v39 = vsel %vm720_vm4, %v695_v30, %v662_v41  ;;  %1939 = vmatprep.mubr.msk.bf16.mxu0 %vm767_vm5, %v726_v43 }
  0xa5   : > { %1940 = vmatmul.mubr.msk.bf16.gmra.mxu0 %vm767_vm5, %v728_v39 }
  0xa6   : > { %v599_v45 = vpop.permute.xlu0 %598 }
  0xa7   : > { %v601_v46 = vpop.permute.xlu1 %600  ;;  %v713_v47 = vsel %vm687_vm3, %v2248_v10, %v599_v45 }
  0xa8   : > { %v715_v4 = vsel %vm687_vm3, %v2266_v33, %v601_v46 }
  0xaa   : > { %v680_v49 = vpop.permute.xlu0 %679 }
  0xab   : > { %v583_v44 = vpop.permute.xlu1 %582  ;;  %v2482_v50 = vsel %vm720_vm4, %v713_v47, %v680_v49 }
  0xac   : > { %1959 = vmatprep.mubr.msk.bf16.mxu1 %vm767_vm5, %v2482_v50  ;;  %v697_v10 = vsel %vm687_vm3, %v2275_v42, %v583_v44 }
  0xae   : > { %v682_v51 = vpop.permute.xlu0 %681 }
  0xaf   : > { %v585_v19 = vpop.permute.xlu1 %584  ;;  %v748_v53 = vsel %vm720_vm4, %v715_v4, %v682_v51 }
  0xb0   : > { %1960 = vmatmul.mubr.msk.bf16.gmra.mxu1 %vm767_vm5, %v748_v53  ;;  %v699_v55 = vsel %vm687_vm3, %v2288_v52, %v585_v19 }
  0xb2   : > { %v664_v34 = vpop.permute.xlu0 %663 }
  0xb3   : > { %v666_v58 = vpop.permute.xlu1 %665  ;;  %v730_v56 = vsel %vm720_vm4, %v697_v10, %v664_v34 }
  0xb4   : > { %v732_v59 = vsel %vm720_vm4, %v699_v55, %v666_v58  ;;  %1943 = vmatprep.mubr.msk.bf16.mxu0 %vm767_vm5, %v730_v56 }
  0xb5   : > { %1944 = vmatmul.mubr.msk.bf16.gmra.mxu0 %vm767_vm5, %v732_v59 }
  0xb6   : > { %v603_v33 = vpop.permute.xlu0 %602 }
  0xb7   : > { %v605_v60 = vpop.permute.xlu1 %604  ;;  %v717_v61 = vsel %vm687_vm3, %v2303_v7, %v603_v33 }
  0xb8   : > { %v719_v52 = vsel %vm687_vm3, %v2315_v18, %v605_v60 }
  0xba   : > { %v684_v62 = vpop.permute.xlu0 %683 }
  0xbb   : > { %v587_v42 = vpop.permute.xlu1 %586  ;;  %v750_v57 = vsel %vm720_vm4, %v717_v61, %v684_v62 }
  0xbc   : > { %1963 = vmatprep.mubr.msk.bf16.mxu1 %vm767_vm5, %v750_v57  ;;  %v701_v7 = vsel %vm687_vm3, %v2328_v27, %v587_v42 }
  0xbe   : > { %v686_v63 = vpop.permute.xlu0 %685 }
  0xbf   : > { %v589_v1 = vpop.permute.xlu1 %588  ;;  %v752_v3 = vsel %vm720_vm4, %v719_v52, %v686_v63 }
  0xc0   : > { %1964 = vmatmul.mubr.msk.bf16.gmra.mxu1 %vm767_vm5, %v752_v3  ;;  %v703_v5 = vsel %vm687_vm3, %v2347_v48, %v589_v1 }
  0xc1   : > { %1969 = vmatprep.mubr.msk.bf16.mxu1 %vm767_vm5, %v724_v8 }
  0xc2   : > { %v668_v9 = vpop.permute.xlu0 %667 }
  0xc3   : > { %v670_v12 = vpop.permute.xlu1 %669  ;;  %v734_v13 = vsel %vm720_vm4, %v701_v7, %v668_v9 }
  0xc4   : > { %v736_v18 = vsel %vm720_vm4, %v703_v5, %v670_v12  ;;  %1947 = vmatprep.mubr.msk.bf16.mxu0 %vm767_vm5, %v734_v13 }
  0xc5   : > { %1948 = vmatmul.mubr.msk.bf16.gmra.mxu0 %vm767_vm5, %v736_v18 }
  0xc6   : > { %2003 = vmatprep.mubr.msk.bf16.mxu0 %vm767_vm5, %v726_v43  ;;  %v986_v14 = vpop.permute.xlu0 %985 }
  0xc7   : > { %v991_v15 = vpop.permute.xlu1 %990  ;;  %v993_v27 = vsel %vm687_vm3, %v2352_v54, %v986_v14 }
  0xc8   : > { %1970 = vmatmul.mubr.msk.bf16.vlgmr.msra.gmra.mxu1 %vm767_vm5, %v726_v43  ;;  %v995_v48 = vsel %vm720_vm4, %v993_v27, %v991_v15 }
  0xc9   : > { %1973 = vmatprep.mubr.msk.bf16.mxu1 %vm767_vm5, %v728_v39 }
  0xca   : > { %v1223_v20 = vpop.permute.xlu0 %1222 }
  0xcb   : > { %v1228_v17 = vpop.permute.xlu1 %1227  ;;  %v1230_v21 = vsel %vm687_vm3, %v2374_v11, %v1223_v20 }
  0xcc   : > { %v1232_v22 = vsel %vm720_vm4, %v1230_v21, %v1228_v17 }
  0xcd   : > { %2004 = vmatmul.mubr.msk.bf16.vlgmr.msra.gmra.mxu0 %vm767_vm5, %v728_v39 }
  0xce   : > { %2007 = vmatprep.mubr.msk.bf16.mxu0 %vm767_vm5, %v730_v56 }
  0xd0   : > { %1974 = vmatmul.mubr.msk.bf16.gmra.mxu1 %vm767_vm5, %v730_v56 }
  0xd1   : > { %1977 = vmatprep.mubr.msk.bf16.mxu1 %vm767_vm5, %v732_v59 }
  0xd5   : > { %2008 = vmatmul.mubr.msk.bf16.gmra.mxu0 %vm767_vm5, %v732_v59 }
  0xd6   : > { %2011 = vmatprep.mubr.msk.bf16.mxu0 %vm767_vm5, %v734_v13 }
  0xd8   : > { %1978 = vmatmul.mubr.msk.bf16.gmra.mxu1 %vm767_vm5, %v734_v13 }
  0xd9   : > { %1981 = vmatprep.mubr.msk.bf16.mxu1 %vm767_vm5, %v736_v18 }
  0xdd   : > { %2012 = vmatmul.mubr.msk.bf16.gmra.mxu0 %vm767_vm5, %v736_v18 }
  0xde   : > { %2015 = vmatprep.mubr.msk.bf16.mxu0 %vm767_vm5, %v2438_v16 }
  0xe0   : > { %1982 = vmatmul.mubr.msk.bf16.gmra.mxu1 %vm767_vm5, %v2438_v16 }
  0xe1   : > { %1985 = vmatprep.mubr.msk.bf16.mxu1 %vm767_vm5, %v2450_v26 }
  0xe5   : > { %2016 = vmatmul.mubr.msk.bf16.gmra.mxu0 %vm767_vm5, %v2450_v26 }
  0xe6   : > { %2019 = vmatprep.mubr.msk.bf16.mxu0 %vm767_vm5, %v2460_v35 }
  0xe8   : > { %1986 = vmatmul.mubr.msk.bf16.gmra.mxu1 %vm767_vm5, %v2460_v35 }
  0xe9   : > { %1989 = vmatprep.mubr.msk.bf16.mxu1 %vm767_vm5, %v2467_v29 }
  0xed   : > { %2020 = vmatmul.mubr.msk.bf16.gmra.mxu0 %vm767_vm5, %v2467_v29 }
  0xee   : > { %2023 = vmatprep.mubr.msk.bf16.mxu0 %vm767_vm5, %v2482_v50 }
  0xf0   : > { %1990 = vmatmul.mubr.msk.bf16.gmra.mxu1 %vm767_vm5, %v2482_v50  ;;  %v2607_v50 = vld [vmem:[%s2752_s2] ss:$0 sm:$0xff] }
  0xf1   : > { %1993 = vmatprep.mubr.msk.bf16.mxu1 %vm767_vm5, %v748_v53 }
  0xf5   : > { %2024 = vmatmul.mubr.msk.bf16.gmra.mxu0 %vm767_vm5, %v748_v53 }
  0xf6   : > { %2027 = vmatprep.mubr.msk.bf16.mxu0 %vm767_vm5, %v750_v57 }
  0xf8   : > { %1994 = vmatmul.mubr.msk.bf16.gmra.mxu1 %vm767_vm5, %v750_v57 }
  0xf9   : > { %1997 = vmatprep.mubr.msk.bf16.mxu1 %vm767_vm5, %v752_v3 }
  0xfd   : > { %2028 = vmatmul.mubr.msk.bf16.gmra.mxu0 %vm767_vm5, %v752_v3 }
  0xfe   : > { %2031 = vmatprep.mubr.msk.bf16.mxu0 %vm767_vm5, %v995_v48 }
 0x100   : > { %1998 = vmatmul.mubr.msk.bf16.gmra.mxu1 %vm767_vm5, %v995_v48 }
 0x105   : > { %2032 = vmatmul.mubr.msk.bf16.gmra.mxu0 %vm767_vm5, %v1232_v22 }
 0x155   : > { %v2562_v54 = vpop.f32.mrf.mxu1 }
 0x156   : > { %v1937_v16 = vpop.f32.mrf.mxu0 }
 0x157   : > { %v2564_v11 = vpop.f32.mrf.mxu1  ;;  %v847_v53 = vadd.f32 %v1937_v16, %v2607_v50 }
 0x158   : > { %v838_v24 = vpop.f32.mrf.mxu0 }
 0x159   : > { %v2566_v23 = vpop.f32.mrf.mxu1  ;;  %v839_v34 = vadd.f32 %v2607_v50, %v838_v24 }
 0x15a   : > { %v1938_v8 = vpop.f32.mrf.mxu0 }
 0x15b   : > { %v2568_v2 = vpop.f32.mrf.mxu1  ;;  %v850_v33 = vadd.f32 %v1938_v8, %v2607_v50 }
 0x15c   : > { %v841_v28 = vpop.f32.mrf.mxu0 }
 0x15d   : > { %v842_v57 = vadd.f32 %v2607_v50, %v841_v28 }
 0x160   : > { %v2570_v26 = vpop.f32.mrf.mxu1 }
 0x162   : > { %v2572_v31 = vpop.f32.mrf.mxu1 }
 0x164   : > { %v2574_v6 = vpop.f32.mrf.mxu1 }
 0x165   : > { %v1941_v0 = vpop.f32.mrf.mxu0 }
 0x166   : > { %v2576_v35 = vpop.f32.mrf.mxu1  ;;  %v863_v7 = vadd.f32 %v1941_v0, %v2607_v50 }
 0x167   : > { %v854_v32 = vpop.f32.mrf.mxu0 }
 0x168   : > { %v855_v15 = vadd.f32 %v2607_v50, %v854_v32 }
 0x169   : > { %v1942_v36 = vpop.f32.mrf.mxu0 }
 0x16a   : > { %v866_v16 = vadd.f32 %v1942_v36, %v2607_v50 }
 0x16b   : > { %v857_v38 = vpop.f32.mrf.mxu0 }
 0x170   : > { %v2578_v37 = vpop.f32.mrf.mxu1 }
 0x172   : > { %v2580_v29 = vpop.f32.mrf.mxu1 }
 0x174   : > { %v2584_v30 = vpop.f32.mrf.mxu1 }
 0x175   : > { %v2582_v25 = vpop.f32.mrf.mxu0 }
 0x176   : > { %v2588_v41 = vpop.f32.mrf.mxu1 }
 0x177   : > { %v2586_v40 = vpop.f32.mrf.mxu0 }
 0x179   : > { %v2590_v43 = vpop.f32.mrf.mxu0 }
 0x17b   : > { %v2596_v46 = vpop.f32.mrf.mxu0 }
 0x180   : > { %v2592_v39 = vpop.f32.mrf.mxu1 }
 0x182   : > { %v2594_v45 = vpop.f32.mrf.mxu1 }
 0x184   : > { %v2598_v47 = vpop.f32.mrf.mxu1 }
 0x185   : > { %v2600_v49 = vpop.f32.mrf.mxu0 }
 0x186   : > { %v2602_v44 = vpop.f32.mrf.mxu1 }
 0x187   : > { %v2609_v4 = vpop.f32.mrf.mxu0 }
 0x188   : > { %v1971_v51 = vpop.f32.mrf.mxu1 }
 0x189   : > { %v2611_v19 = vpop.f32.mrf.mxu0  ;;  %v1172_v58 = vadd.f32 %v1971_v51, %v847_v53  ;;  %v858_v53 = vadd.f32 %v2607_v50, %v857_v38 }
 0x18a   : > { %v1043_v10 = vpop.f32.mrf.mxu1 }
 0x18b   : > { %v2614_v55 = vpop.f32.mrf.mxu0  ;;  %v1170_v60 = vadd.f32 %v1043_v10, %v839_v34 }
 0x18c   : > { %v1972_v56 = vpop.f32.mrf.mxu1 }
 0x18d   : > { %v2005_v59 = vpop.f32.mrf.mxu0  ;;  %v1173_v52 = vadd.f32 %v1972_v56, %v850_v33  ;;  %v879_v33 = vadd.f32 %v2582_v25, %v2607_v50 }
 0x18e   : > { %v1409_v61 = vadd.f32 %v2005_v59, %v1172_v58  ;;  %v1046_v62 = vpop.f32.mrf.mxu1 }
 0x18f   : > { %v1280_v42 = vpop.f32.mrf.mxu0  ;;  %v1171_v12 = vadd.f32 %v1046_v62, %v842_v57 }
 0x190   : > { %v1441_v63 = vmax.f32 %v1409_v61, 0.0  ;;  %v1407_v1 = vadd.f32 %v1280_v42, %v1170_v60  ;;  %v1975_v3 = vpop.f32.mrf.mxu1 }
 0x191   : > { %v2006_v5 = vpop.f32.mrf.mxu0  ;;  %v1176_v20 = vadd.f32 %v1975_v3, %v863_v7 }
 0x192   : > { %v1852_v9 = vpack.c.bf16 %v1441_v63, %v1441_v63  ;;  %v1439_v13 = vmax.f32 %v1407_v1, 0.0  ;;  %v1410_v18 = vadd.f32 %v2006_v5, %v1173_v52  ;;  %v1059_v14 = vpop.f32.mrf.mxu1  ;;  %v871_v52 = vadd.f32 %v2607_v50, %v2586_v40 }
 0x193   : > { %v1283_v27 = vpop.f32.mrf.mxu0  ;;  %v1174_v28 = vadd.f32 %v1059_v14, %v855_v15 }
 0x194   : > { %1602 = vst.msk [vmem:[%s2624_s6 + $0x8] sm:$0xf] %vm1599_vm6, %v1852_v9  ;;  %v1850_v48 = vpack.c.bf16 %v1439_v13, %v1439_v13  ;;  %v1442_v17 = vmax.f32 %v1410_v18, 0.0  ;;  %v1408_v21 = vadd.f32 %v1283_v27, %v1171_v12  ;;  %v1976_v22 = vpop.f32.mrf.mxu1  ;;  %v882_v9 = vadd.f32 %v2590_v43, %v2607_v50 }
 0x195   : > { %v2009_v24 = vpop.f32.mrf.mxu0  ;;  %v1177_v58 = vadd.f32 %v1976_v22, %v866_v16  ;;  %v874_v27 = vadd.f32 %v2607_v50, %v2596_v46  ;;  %v895_v16 = vadd.f32 %v2600_v49, %v2607_v50 }
 0x196   : > { %1600 = vst.msk [vmem:[%s2624_s6] sm:$0xf] %vm1599_vm6, %v1850_v48  ;;  %v1853_v8 = vpack.c.bf16 %v1442_v17, %v1442_v17  ;;  %v1440_v0 = vmax.f32 %v1408_v21, 0.0  ;;  %v1413_v51 = vadd.f32 %v2009_v24, %v1176_v20  ;;  %v1062_v32 = vpop.f32.mrf.mxu1 }
 0x197   : > { %v1296_v10 = vpop.f32.mrf.mxu0  ;;  %v1175_v62 = vadd.f32 %v1062_v32, %v858_v53  ;;  %v887_v32 = vadd.f32 %v2607_v50, %v2609_v4 }
 0x198   : > { %1603 = vst.msk [vmem:[%s2624_s6 + $0xc] sm:$0xf] %vm1599_vm6, %v1853_v8  ;;  %v1851_v34 = vpack.c.bf16 %v1440_v0, %v1440_v0  ;;  %v1445_v56 = vmax.f32 %v1413_v51, 0.0  ;;  %v1411_v59 = vadd.f32 %v1296_v10, %v1174_v28  ;;  %v1979_v36 = vpop.f32.mrf.mxu1 }
 0x199   : > { %v2010_v60 = vpop.f32.mrf.mxu0  ;;  %v1180_v3 = vadd.f32 %v1979_v36, %v879_v33 }
 0x19a   : > { %1601 = vst.msk [vmem:[%s2624_s6 + $0x4] sm:$0xf] %vm1599_vm6, %v1851_v34  ;;  %v1856_v61 = vpack.c.bf16 %v1445_v56, %v1445_v56  ;;  %v1443_v42 = vmax.f32 %v1411_v59, 0.0  ;;  %v1414_v38 = vadd.f32 %v2010_v60, %v1177_v58  ;;  %v1075_v57 = vpop.f32.mrf.mxu1  ;;  %v898_v59 = vadd.f32 %v2611_v19, %v2607_v50 }
 0x19b   : > { %v1299_v63 = vpop.f32.mrf.mxu0  ;;  %v1178_v18 = vadd.f32 %v1075_v57, %v871_v52 }
 0x19c   : > { %1606 = vst.msk [vmem:[%s2624_s6 + $0x18] sm:$0xf] %vm1599_vm6, %v1856_v61  ;;  %v1854_v1 = vpack.c.bf16 %v1443_v42, %v1443_v42  ;;  %v1446_v7 = vmax.f32 %v1414_v38, 0.0  ;;  %v1412_v25 = vadd.f32 %v1299_v63, %v1175_v62  ;;  %v1980_v5 = vpop.f32.mrf.mxu1  ;;  %v890_v42 = vadd.f32 %v2607_v50, %v2614_v55 }
 0x19d   : > { %v2013_v12 = vpop.f32.mrf.mxu0  ;;  %v1181_v17 = vadd.f32 %v1980_v5, %v882_v9 }
 0x19e   : > { %1604 = vst.msk [vmem:[%s2624_s6 + $0x10] sm:$0xf] %vm1599_vm6, %v1854_v1  ;;  %v1857_v13 = vpack.c.bf16 %v1446_v7, %v1446_v7  ;;  %v1444_v14 = vmax.f32 %v1412_v25, 0.0  ;;  %v1417_v40 = vadd.f32 %v2013_v12, %v1180_v3  ;;  %v1078_v15 = vpop.f32.mrf.mxu1  ;;  %v911_v3 = vadd.f32 %v2562_v54, %v2607_v50 }
 0x19f   : > { %v1312_v48 = vpop.f32.mrf.mxu0  ;;  %v1179_v28 = vadd.f32 %v1078_v15, %v874_v27 }
 0x1a0   : > { %1607 = vst.msk [vmem:[%s2624_s6 + $0x1c] sm:$0xf] %vm1599_vm6, %v1857_v13  ;;  %v1855_v20 = vpack.c.bf16 %v1444_v14, %v1444_v14  ;;  %v1449_v21 = vmax.f32 %v1417_v40, 0.0  ;;  %v1415_v43 = vadd.f32 %v1312_v48, %v1178_v18  ;;  %v1983_v22 = vpop.f32.mrf.mxu1  ;;  %v903_v13 = vadd.f32 %v2607_v50, %v2564_v11 }
 0x1a1   : > { %v2014_v24 = vpop.f32.mrf.mxu0  ;;  %v1184_v34 = vadd.f32 %v1983_v22, %v895_v16  ;;  %v914_v48 = vadd.f32 %v2566_v23, %v2607_v50  ;;  %v906_v16 = vadd.f32 %v2607_v50, %v2568_v2 }
 0x1a2   : > { %1605 = vst.msk [vmem:[%s2624_s6 + $0x14] sm:$0xf] %vm1599_vm6, %v1855_v20  ;;  %v1860_v8 = vpack.c.bf16 %v1449_v21, %v1449_v21  ;;  %v1447_v0 = vmax.f32 %v1415_v43, 0.0  ;;  %v1418_v46 = vadd.f32 %v2014_v24, %v1181_v17  ;;  %v1091_v51 = vpop.f32.mrf.mxu1 }
 0x1a3   : > { %v1315_v53 = vpop.f32.mrf.mxu0  ;;  %v1182_v60 = vadd.f32 %v1091_v51, %v887_v32  ;;  %v927_v51 = vadd.f32 %v2570_v26, %v2607_v50 }
 0x1a4   : > { %1610 = vst.msk [vmem:[%s2624_s6 + $0x28] sm:$0xf] %vm1599_vm6, %v1860_v8  ;;  %v1858_v10 = vpack.c.bf16 %v1447_v0, %v1447_v0  ;;  %v1450_v58 = vmax.f32 %v1418_v46, 0.0  ;;  %v1416_v49 = vadd.f32 %v1315_v53, %v1179_v28  ;;  %v1984_v56 = vpop.f32.mrf.mxu1 }
 0x1a5   : > { %v2017_v36 = vpop.f32.mrf.mxu0  ;;  %v1185_v52 = vadd.f32 %v1984_v56, %v898_v59 }
 0x1a6   : > { %1608 = vst.msk [vmem:[%s2624_s6 + $0x20] sm:$0xf] %vm1599_vm6, %v1858_v10  ;;  %v1861_v33 = vpack.c.bf16 %v1450_v58, %v1450_v58  ;;  %v1448_v61 = vmax.f32 %v1416_v49, 0.0  ;;  %v1421_v4 = vadd.f32 %v2017_v36, %v1184_v34  ;;  %v1094_v62 = vpop.f32.mrf.mxu1  ;;  %v919_v49 = vadd.f32 %v2607_v50, %v2572_v31 }
 0x1a7   : > { %v1328_v38 = vpop.f32.mrf.mxu0  ;;  %v1183_v5 = vadd.f32 %v1094_v62, %v890_v42 }
 0x1a8   : > { %1611 = vst.msk [vmem:[%s2624_s6 + $0x2c] sm:$0xf] %vm1599_vm6, %v1861_v33  ;;  %v1859_v57 = vpack.c.bf16 %v1448_v61, %v1448_v61  ;;  %v1453_v63 = vmax.f32 %v1421_v4, 0.0  ;;  %v1419_v19 = vadd.f32 %v1328_v38, %v1182_v60  ;;  %v1987_v1 = vpop.f32.mrf.mxu1  ;;  %v930_v61 = vadd.f32 %v2574_v6, %v2607_v50 }
 0x1a9   : > { %v2018_v7 = vpop.f32.mrf.mxu0  ;;  %v1188_v40 = vadd.f32 %v1987_v1, %v911_v3 }
 0x1aa   : > { %1609 = vst.msk [vmem:[%s2624_s6 + $0x24] sm:$0xf] %vm1599_vm6, %v1859_v57  ;;  %v1864_v25 = vpack.c.bf16 %v1453_v63, %v1453_v63  ;;  %v1451_v9 = vmax.f32 %v1419_v19, 0.0  ;;  %v1422_v55 = vadd.f32 %v2018_v7, %v1185_v52  ;;  %v1107_v12 = vpop.f32.mrf.mxu1  ;;  %v922_v52 = vadd.f32 %v2607_v50, %v2576_v35 }
 0x1ab   : > { %v1331_v18 = vpop.f32.mrf.mxu0  ;;  %v1186_v21 = vadd.f32 %v1107_v12, %v903_v13 }
 0x1ac   : > { %1614 = vst.msk [vmem:[%s2624_s6 + $0x38] sm:$0xf] %vm1599_vm6, %v1864_v25  ;;  %v1862_v14 = vpack.c.bf16 %v1451_v9, %v1451_v9  ;;  %v1454_v15 = vmax.f32 %v1422_v55, 0.0  ;;  %v1420_v54 = vadd.f32 %v1331_v18, %v1183_v5  ;;  %v1988_v27 = vpop.f32.mrf.mxu1  ;;  %v943_v25 = vadd.f32 %v2578_v37, %v2607_v50 }
 0x1ad   : > { %v2021_v20 = vpop.f32.mrf.mxu0  ;;  %v1189_v28 = vadd.f32 %v1988_v27, %v914_v48  ;;  %v935_v18 = vadd.f32 %v2607_v50, %v2580_v29  ;;  %v946_v48 = vadd.f32 %v2584_v30, %v2607_v50 }
 0x1ae   : > { %1612 = vst.msk [vmem:[%s2624_s6 + $0x30] sm:$0xf] %vm1599_vm6, %v1862_v14  ;;  %v1865_v17 = vpack.c.bf16 %v1454_v15, %v1454_v15  ;;  %v1452_v43 = vmax.f32 %v1420_v54, 0.0  ;;  %v1425_v11 = vadd.f32 %v2021_v20, %v1188_v40  ;;  %v1110_v22 = vpop.f32.mrf.mxu1 }
 0x1af   : > { %v1344_v24 = vpop.f32.mrf.mxu0  ;;  %v1187_v10 = vadd.f32 %v1110_v22, %v906_v16  ;;  %v938_v22 = vadd.f32 %v2607_v50, %v2588_v41 }
 0x1b0   : > { %1615 = vst.msk [vmem:[%s2624_s6 + $0x3c] sm:$0xf] %vm1599_vm6, %v1865_v17  ;;  %v1863_v8 = vpack.c.bf16 %v1452_v43, %v1452_v43  ;;  %v1457_v0 = vmax.f32 %v1425_v11, 0.0  ;;  %v1423_v23 = vadd.f32 %v1344_v24, %v1186_v21  ;;  %v1991_v46 = vpop.f32.mrf.mxu1 }
 0x1b1   : > { %v2022_v32 = vpop.f32.mrf.mxu0  ;;  %v1192_v36 = vadd.f32 %v1991_v46, %v927_v51 }
 0x1b2   : > { %1613 = vst.msk [vmem:[%s2624_s6 + $0x34] sm:$0xf] %vm1599_vm6, %v1863_v8  ;;  %v1868_v53 = vpack.c.bf16 %v1457_v0, %v1457_v0  ;;  %v1455_v34 = vmax.f32 %v1423_v23, 0.0  ;;  %v1426_v2 = vadd.f32 %v2022_v32, %v1189_v28  ;;  %v1123_v58 = vpop.f32.mrf.mxu1  ;;  %v959_v23 = vadd.f32 %v2592_v39, %v2607_v50 }
 0x1b3   : > { %v1347_v56 = vpop.f32.mrf.mxu0  ;;  %v1190_v42 = vadd.f32 %v1123_v58, %v919_v49 }
 0x1b4   : > { %1618 = vst.msk [vmem:[%s2624_s6 + $0x48] sm:$0xf] %vm1599_vm6, %v1868_v53  ;;  %v1866_v59 = vpack.c.bf16 %v1455_v34, %v1455_v34  ;;  %v1458_v33 = vmax.f32 %v1426_v2, 0.0  ;;  %v1424_v26 = vadd.f32 %v1347_v56, %v1187_v10  ;;  %v1992_v60 = vpop.f32.mrf.mxu1  ;;  %v951_v34 = vadd.f32 %v2607_v50, %v2594_v45 }
 0x1b5   : > { %v2025_v4 = vpop.f32.mrf.mxu0  ;;  %v1193_v1 = vadd.f32 %v1992_v60, %v930_v61 }
 0x1b6   : > { %1616 = vst.msk [vmem:[%s2624_s6 + $0x40] sm:$0xf] %vm1599_vm6, %v1866_v59  ;;  %v1869_v62 = vpack.c.bf16 %v1458_v33, %v1458_v33  ;;  %v1456_v38 = vmax.f32 %v1424_v26, 0.0  ;;  %v1429_v31 = vadd.f32 %v2025_v4, %v1192_v36  ;;  %v1126_v57 = vpop.f32.mrf.mxu1  ;;  %v962_v36 = vadd.f32 %v2598_v47, %v2607_v50 }
 0x1b7   : > { %v1360_v63 = vpop.f32.mrf.mxu0  ;;  %v1191_v55 = vadd.f32 %v1126_v57, %v922_v52  ;;  %v954_v4 = vadd.f32 %v2607_v50, %v2602_v44 }
 0x1b8   : > { %1619 = vst.msk [vmem:[%s2624_s6 + $0x4c] sm:$0xf] %vm1599_vm6, %v1869_v62  ;;  %v1867_v19 = vpack.c.bf16 %v1456_v38, %v1456_v38  ;;  %v1461_v3 = vmax.f32 %v1429_v31, 0.0  ;;  %v1427_v6 = vadd.f32 %v1360_v63, %v1190_v42  ;;  %v1995_v7 = vpop.f32.mrf.mxu1 }
 0x1b9   : > { %v2026_v5 = vpop.f32.mrf.mxu0  ;;  %v1196_v15 = vadd.f32 %v1995_v7, %v943_v25 }
 0x1ba   : > { %1617 = vst.msk [vmem:[%s2624_s6 + $0x44] sm:$0xf] %vm1599_vm6, %v1867_v19  ;;  %v1872_v9 = vpack.c.bf16 %v1461_v3, %v1461_v3  ;;  %v1459_v12 = vmax.f32 %v1427_v6, 0.0  ;;  %v1430_v35 = vadd.f32 %v2026_v5, %v1193_v1  ;;  %v1139_v13 = vpop.f32.mrf.mxu1 }
 0x1bb   : > { %v1363_v14 = vpop.f32.mrf.mxu0  ;;  %v1194_v21 = vadd.f32 %v1139_v13, %v935_v18 }
 0x1bc   : > { %1622 = vst.msk [vmem:[%s2624_s6 + $0x58] sm:$0xf] %vm1599_vm6, %v1872_v9  ;;  %v1870_v40 = vpack.c.bf16 %v1459_v12, %v1459_v12  ;;  %v1462_v54 = vmax.f32 %v1430_v35, 0.0  ;;  %v1428_v37 = vadd.f32 %v1363_v14, %v1191_v55  ;;  %v1996_v27 = vpop.f32.mrf.mxu1 }
 0x1bd   : > { %v2029_v20 = vpop.f32.mrf.mxu0  ;;  %v1197_v8 = vadd.f32 %v1996_v27, %v946_v48 }
 0x1be   : > { %1620 = vst.msk [vmem:[%s2624_s6 + $0x50] sm:$0xf] %vm1599_vm6, %v1870_v40  ;;  %v1873_v17 = vpack.c.bf16 %v1462_v54, %v1462_v54  ;;  %v1460_v43 = vmax.f32 %v1428_v37, 0.0  ;;  %v1433_v29 = vadd.f32 %v2029_v20, %v1196_v15  ;;  %v1142_v11 = vpop.f32.mrf.mxu1 }
 0x1bf   : > { %v1376_v16 = vpop.f32.mrf.mxu0  ;;  %v1195_v32 = vadd.f32 %v1142_v11, %v938_v22 }
 0x1c0   : > { %1623 = vst.msk [vmem:[%s2624_s6 + $0x5c] sm:$0xf] %vm1599_vm6, %v1873_v17  ;;  %v1871_v24 = vpack.c.bf16 %v1460_v43, %v1460_v43  ;;  %v1465_v28 = vmax.f32 %v1433_v29, 0.0  ;;  %v1431_v30 = vadd.f32 %v1376_v16, %v1194_v21  ;;  %v1999_v0 = vpop.f32.mrf.mxu1 }
 0x1c1   : > { %v2030_v46 = vpop.f32.mrf.mxu0  ;;  %v1200_v49 = vadd.f32 %v1999_v0, %v959_v23 }
 0x1c2   : > { %1621 = vst.msk [vmem:[%s2624_s6 + $0x54] sm:$0xf] %vm1599_vm6, %v1871_v24  ;;  %v1876_v51 = vpack.c.bf16 %v1465_v28, %v1465_v28  ;;  %v1463_v53 = vmax.f32 %v1431_v30, 0.0  ;;  %v1434_v41 = vadd.f32 %v2030_v46, %v1197_v8  ;;  %v1155_v10 = vpop.f32.mrf.mxu1 }
 0x1c3   : > { %v1379_v2 = vpop.f32.mrf.mxu0  ;;  %v1198_v60 = vadd.f32 %v1155_v10, %v951_v34 }
 0x1c4   : > { %1626 = vst.msk [vmem:[%s2624_s6 + $0x68] sm:$0xf] %vm1599_vm6, %v1876_v51  ;;  %v1874_v58 = vpack.c.bf16 %v1463_v53, %v1463_v53  ;;  %v1466_v56 = vmax.f32 %v1434_v41, 0.0  ;;  %v1432_v39 = vadd.f32 %v1379_v2, %v1195_v32  ;;  %v2000_v59 = vpop.f32.mrf.mxu1 }
 0x1c5   : > { %v2033_v33 = vpop.f32.mrf.mxu0  ;;  %v1201_v31 = vadd.f32 %v2000_v59, %v962_v36 }
 0x1c6   : > { %1624 = vst.msk [vmem:[%s2624_s6 + $0x60] sm:$0xf] %vm1599_vm6, %v1874_v58  ;;  %v1877_v26 = vpack.c.bf16 %v1466_v56, %v1466_v56  ;;  %v1464_v61 = vmax.f32 %v1432_v39, 0.0  ;;  %v1437_v45 = vadd.f32 %v2033_v33, %v1200_v49  ;;  %v1158_v62 = vpop.f32.mrf.mxu1 }
 0x1c7   : > { %v1392_v42 = vpop.f32.mrf.mxu0  ;;  %v1199_v19 = vadd.f32 %v1158_v62, %v954_v4 }
 0x1c8   : > { %1627 = vst.msk [vmem:[%s2624_s6 + $0x6c] sm:$0xf] %vm1599_vm6, %v1877_v26  ;;  %v1875_v38 = vpack.c.bf16 %v1464_v61, %v1464_v61  ;;  %v1469_v47 = vmax.f32 %v1437_v45, 0.0  ;;  %v1435_v57 = vadd.f32 %v1392_v42, %v1198_v60 }
 0x1c9   : > { %v2034_v52 = vpop.f32.mrf.mxu0 }
 0x1ca   : > { %1625 = vst.msk [vmem:[%s2624_s6 + $0x64] sm:$0xf] %vm1599_vm6, %v1875_v38  ;;  %v1880_v63 = vpack.c.bf16 %v1469_v47, %v1469_v47  ;;  %v1467_v1 = vmax.f32 %v1435_v57, 0.0  ;;  %v1438_v3 = vadd.f32 %v2034_v52, %v1201_v31 }
 0x1cb   : > { %v1395_v6 = vpop.f32.mrf.mxu0 }
 0x1cc   : > { %1630 = vst.msk [vmem:[%s2624_s6 + $0x78] sm:$0xf] %vm1599_vm6, %v1880_v63  ;;  %v1878_v44 = vpack.c.bf16 %v1467_v1, %v1467_v1  ;;  %v1470_v50 = vmax.f32 %v1438_v3, 0.0  ;;  %v1436_v7 = vadd.f32 %v1395_v6, %v1199_v19 }
 0x1ce   : > { %1628 = vst.msk [vmem:[%s2624_s6 + $0x70] sm:$0xf] %vm1599_vm6, %v1878_v44  ;;  %v1881_v25 = vpack.c.bf16 %v1470_v50, %v1470_v50  ;;  %v1468_v5 = vmax.f32 %v1436_v7, 0.0 }
 0x1d0   : > { %1631 = vst.msk [vmem:[%s2624_s6 + $0x7c] sm:$0xf] %vm1599_vm6, %v1881_v25  ;;  %v1879_v9 = vpack.c.bf16 %v1468_v5, %v1468_v5 }
 0x1d2   : > { %1629 = vst.msk [vmem:[%s2624_s6 + $0x74] sm:$0xf] %vm1599_vm6, %v1879_v9 }
 0x1d3 PF: > { %s13_s14 = sadd.s32 1, %s2129_s14   ;;  %s2754_s12 = smov %s2125_s13 }
 0x1d4   : > { %p10_p5 = scmp.ge.s32.totalorder %s13_s14, 4   ;;  %s2755_s13 = smov %s2757_s15 }
 0x1d6   :  { %12 = sbr.rel (!%p10_p5) target bundleno = 2 (0x2), region = 65 }

</bundles_post_ra>
